<compile_context>
chip_gen: v5e
topology: v5e:2x2
jax: 0.10.0
libtpu: 0.0.40
codegen_flags: <defaults>
</compile_context>

<pallas_src>
import math

import jax
import jax.numpy as jnp
from jax.experimental import pallas as pl
from jax.experimental.pallas import tpu as pltpu


def _round_up(n, m):
    return ((n + m - 1) // m) * m


def _mlp_kernel(x_ref, w1_ref, b1_ref, w2_ref, b2_ref, w3_ref, b3_ref, o_ref):
    """Fused forward for one batch tile: relu(x@W1+b1) -> relu(.@W2+b2) -> .@W3+b3."""
    w_dtype = w1_ref.dtype  # f32 or bf16 (compute dtype for MXU inputs)

    x = x_ref[...].astype(w_dtype)

    h1 = jnp.dot(x, w1_ref[...], preferred_element_type=jnp.float32) + b1_ref[...]
    h1 = jnp.maximum(h1, 0.0)

    h2 = jnp.dot(h1.astype(w_dtype), w2_ref[...],
                 preferred_element_type=jnp.float32) + b2_ref[...]
    h2 = jnp.maximum(h2, 0.0)

    out = jnp.dot(h2.astype(w_dtype), w3_ref[...],
                  preferred_element_type=jnp.float32) + b3_ref[...]
    o_ref[...] = out.astype(o_ref.dtype)


def fully_connected_nn(x, params, *, block_b=2048, use_bf16=True,
                       vmem_limit_bytes=None):
    """Fused MLP forward pass with a batch-tiled Pallas grid.

    x:       (B, input_size) float32
    params:  dict with w1 (in,128), b1 (1,128), w2 (128,64), b2 (1,64),
             w3 (64,2), b3 (1,2), all float32
    returns: (B, 2) float32 logits (no sigmoid, matching the PyTorch forward)

    block_b: target rows per batch tile (rounded to a multiple of 8; raise it
             on v6e/v5e, keep ~4096-8192 on v7x's smaller VMEM).
    use_bf16: cast weights + MXU inputs to bf16 (f32 accumulation); halves the
             resident weight footprint and feeds the MXU its native dtype.
    """
    B, D = x.shape
    compute_dtype = jnp.bfloat16 if use_bf16 else jnp.float32

    # Weights in compute dtype; biases stay f32 (added onto f32 accumulators).
    w1 = params["w1"].astype(compute_dtype)
    w2 = params["w2"].astype(compute_dtype)
    w3 = params["w3"].astype(compute_dtype)
    b1 = params["b1"].astype(jnp.float32)
    b2 = params["b2"].astype(jnp.float32)
    b3 = params["b3"].astype(jnp.float32)

    # Batch tile: multiple of 8 (f32 sublanes), no larger than needed.
    tb = min(_round_up(block_b, 8), _round_up(B, 8))
    num_tiles = pl.cdiv(B, tb)
    b_pad = num_tiles * tb
    if b_pad != B:
        x = jnp.pad(x, ((0, b_pad - B), (0, 0)))

    def x_map(i):
        return (i, 0)

    def const_map(i):
        return (0, 0)

    out = pl.pallas_call(
        _mlp_kernel,
        out_shape=jax.ShapeDtypeStruct((b_pad, 2), jnp.float32),
        grid=(num_tiles,),
        in_specs=[
            pl.BlockSpec((tb, D), x_map),              # streamed x tiles
            pl.BlockSpec(w1.shape, const_map),          # resident weights/biases
            pl.BlockSpec(b1.shape, const_map),
            pl.BlockSpec(w2.shape, const_map),
            pl.BlockSpec(b2.shape, const_map),
            pl.BlockSpec(w3.shape, const_map),
            pl.BlockSpec(b3.shape, const_map),
        ],
        out_specs=pl.BlockSpec((tb, 2), x_map),
        compiler_params=pltpu.CompilerParams(
            dimension_semantics=("parallel",),          # v7x: shard batch over 2 TCs
            vmem_limit_bytes=vmem_limit_bytes,
        ),
    )(x, w1, b1, w2, b2, w3, b3)

    return out[:B]


def init_params(key, input_size):
    """Deterministic init mirroring nn.Linear's default U(-1/sqrt(fan_in), 1/sqrt(fan_in)).

    Weights stored as (in_features, out_features) so the kernel does x @ W + b.
    """
    dims = [(input_size, 128), (128, 64), (64, 2)]
    params = {}
    for i, (fan_in, fan_out) in enumerate(dims, start=1):
        key, kw, kb = jax.random.split(key, 3)
        bound = 1.0 / math.sqrt(fan_in)
        params[f"w{i}"] = jax.random.uniform(
            kw, (fan_in, fan_out), jnp.float32, -bound, bound)
        # bias kept 2D (1, fan_out) for clean broadcasting inside the kernel
        params[f"b{i}"] = jax.random.uniform(
            kb, (1, fan_out), jnp.float32, -bound, bound)
    return params


def reference_forward(x, params):
    h1 = jnp.maximum(x @ params["w1"] + params["b1"], 0.0)
    h2 = jnp.maximum(h1 @ params["w2"] + params["b2"], 0.0)
    return h2 @ params["w3"] + params["b3"]


if __name__ == "__main__":
    key = jax.random.PRNGKey(0)
    batch, input_size = 8, 32

    key, kx = jax.random.split(key)
    x = jax.random.normal(kx, (batch, input_size), jnp.float32)
    params = init_params(key, input_size)
    ref = reference_forward(x, params)

    # 1) f32 path: bit-parity-level check against the pure-JAX reference.
    out_f32 = jax.block_until_ready(
        fully_connected_nn(x, params, use_bf16=False))
    assert out_f32.shape == (batch, 2)
    assert jnp.allclose(out_f32, ref, atol=1e-5, rtol=1e-5)

    # 2) bf16 fast path (default): f32 accumulation, small numerics delta.
    out_bf16 = jax.block_until_ready(
        fully_connected_nn(x, params, use_bf16=True))
    assert out_bf16.shape == (batch, 2)
    assert jnp.allclose(out_bf16, ref, atol=3e-2, rtol=3e-2)

    # 3) Batch not divisible by the tile: exercises the grid + padding path.
    key, kx2 = jax.random.split(key)
    x2 = jax.random.normal(kx2, (20, input_size), jnp.float32)
    out2 = jax.block_until_ready(
        fully_connected_nn(x2, params, block_b=8, use_bf16=False))
    ref2 = reference_forward(x2, params)
    assert out2.shape == (20, 2)
    assert jnp.allclose(out2, ref2, atol=1e-5, rtol=1e-5)

    print("KERNEL_OK")
</pallas_src>

<mosaic_0001>
module attributes {stable_mosaic.version = 11 : i64} {
  func.func @_mlp_kernel(%arg0: i32, %arg1: memref<8x32xf32, #tpu.memory_space<vmem>>, %arg2: memref<32x128xf32, #tpu.memory_space<vmem>>, %arg3: memref<1x128xf32, #tpu.memory_space<vmem>>, %arg4: memref<128x64xf32, #tpu.memory_space<vmem>>, %arg5: memref<1x64xf32, #tpu.memory_space<vmem>>, %arg6: memref<64x2xf32, #tpu.memory_space<vmem>>, %arg7: memref<1x2xf32, #tpu.memory_space<vmem>>, %arg8: memref<8x2xf32, #tpu.memory_space<vmem>>) attributes {dimension_semantics = [#tpu.dimension_semantics<parallel>], iteration_bounds = array<i64: 1>, scalar_prefetch = 0 : i64, scratch_operands = 0 : i64, tpu.core_type = #tpu.core_type<tc>, window_params = [{transform_indices = @transform_0, window_bounds = array<i64: 8, 32>}, {pipeline_mode = #tpu.pipeline_mode<synchronous>, transform_indices = @transform_1, window_bounds = array<i64: 32, 128>}, {pipeline_mode = #tpu.pipeline_mode<synchronous>, transform_indices = @transform_2, window_bounds = array<i64: 1, 128>}, {pipeline_mode = #tpu.pipeline_mode<synchronous>, transform_indices = @transform_3, window_bounds = array<i64: 128, 64>}, {pipeline_mode = #tpu.pipeline_mode<synchronous>, transform_indices = @transform_4, window_bounds = array<i64: 1, 64>}, {pipeline_mode = #tpu.pipeline_mode<synchronous>, transform_indices = @transform_5, window_bounds = array<i64: 64, 2>}, {pipeline_mode = #tpu.pipeline_mode<synchronous>, transform_indices = @transform_6, window_bounds = array<i64: 1, 2>}, {transform_indices = @transform_7, window_bounds = array<i64: 8, 2>}]} {
    %c0 = arith.constant 0 : index
    %c0_0 = arith.constant 0 : index
    %0 = vector.load %arg1[%c0, %c0_0] : memref<8x32xf32, #tpu.memory_space<vmem>>, vector<8x32xf32>
    %c0_1 = arith.constant 0 : index
    %c0_2 = arith.constant 0 : index
    %1 = vector.load %arg2[%c0_1, %c0_2] : memref<32x128xf32, #tpu.memory_space<vmem>>, vector<32x128xf32>
    %cst = arith.constant dense<0.000000e+00> : vector<8x128xf32>
    %2 = tpu.matmul %0, %1, %cst {dimension_numbers = #tpu.dot_dimension_numbers<[1], [0], [0], [1], [0, 0, 1, 1], [], []>} : vector<8x32xf32>, vector<32x128xf32>, vector<8x128xf32> -> vector<8x128xf32>
    %c0_3 = arith.constant 0 : index
    %c0_4 = arith.constant 0 : index
    %3 = vector.load %arg3[%c0_3, %c0_4] : memref<1x128xf32, #tpu.memory_space<vmem>>, vector<1x128xf32>
    %4 = vector.broadcast %3 : vector<1x128xf32> to vector<8x128xf32>
    %5 = arith.addf %2, %4 : vector<8x128xf32>
    %cst_5 = arith.constant 0.000000e+00 : f32
    %6 = vector.broadcast %cst_5 : f32 to vector<8x128xf32>
    %7 = arith.maximumf %5, %6 : vector<8x128xf32>
    %c0_6 = arith.constant 0 : index
    %c0_7 = arith.constant 0 : index
    %8 = vector.load %arg4[%c0_6, %c0_7] : memref<128x64xf32, #tpu.memory_space<vmem>>, vector<128x64xf32>
    %cst_8 = arith.constant dense<0.000000e+00> : vector<8x64xf32>
    %9 = tpu.matmul %7, %8, %cst_8 {dimension_numbers = #tpu.dot_dimension_numbers<[1], [0], [0], [1], [0, 0, 1, 1], [], []>} : vector<8x128xf32>, vector<128x64xf32>, vector<8x64xf32> -> vector<8x64xf32>
    %c0_9 = arith.constant 0 : index
    %c0_10 = arith.constant 0 : index
    %10 = vector.load %arg5[%c0_9, %c0_10] : memref<1x64xf32, #tpu.memory_space<vmem>>, vector<1x64xf32>
    %11 = vector.broadcast %10 : vector<1x64xf32> to vector<8x64xf32>
    %12 = arith.addf %9, %11 : vector<8x64xf32>
    %cst_11 = arith.constant 0.000000e+00 : f32
    %13 = vector.broadcast %cst_11 : f32 to vector<8x64xf32>
    %14 = arith.maximumf %12, %13 : vector<8x64xf32>
    %c0_12 = arith.constant 0 : index
    %c0_13 = arith.constant 0 : index
    %15 = vector.load %arg6[%c0_12, %c0_13] : memref<64x2xf32, #tpu.memory_space<vmem>>, vector<64x2xf32>
    %cst_14 = arith.constant dense<0.000000e+00> : vector<8x2xf32>
    %16 = tpu.matmul %14, %15, %cst_14 {dimension_numbers = #tpu.dot_dimension_numbers<[1], [0], [0], [1], [0, 0, 1, 1], [], []>} : vector<8x64xf32>, vector<64x2xf32>, vector<8x2xf32> -> vector<8x2xf32>
    %c0_15 = arith.constant 0 : index
    %c0_16 = arith.constant 0 : index
    %17 = vector.load %arg7[%c0_15, %c0_16] : memref<1x2xf32, #tpu.memory_space<vmem>>, vector<1x2xf32>
    %18 = vector.broadcast %17 : vector<1x2xf32> to vector<8x2xf32>
    %19 = arith.addf %16, %18 : vector<8x2xf32>
    %c0_17 = arith.constant 0 : index
    %c0_18 = arith.constant 0 : index
    %20 = vector.load %arg8[%c0_17, %c0_18] : memref<8x2xf32, #tpu.memory_space<vmem>>, vector<8x2xf32>
    tpu.vector_store %arg8[%c0_17, %c0_18], %19 {strides = array<i32>} : memref<8x2xf32, #tpu.memory_space<vmem>>, vector<8x2xf32>,
    return
  }
  func.func @transform_0(%arg0: i32) -> (i32, i32) {
    %c0_i32 = arith.constant 0 : i32
    %c0_i32_0 = arith.constant 0 : i32
    return %arg0, %c0_i32 : i32, i32
  }
  func.func @transform_1(%arg0: i32) -> (i32, i32) {
    %c0_i32 = arith.constant 0 : i32
    %c0_i32_0 = arith.constant 0 : i32
    %c0_i32_1 = arith.constant 0 : i32
    return %c0_i32, %c0_i32_0 : i32, i32
  }
  func.func @transform_2(%arg0: i32) -> (i32, i32) {
    %c0_i32 = arith.constant 0 : i32
    %c0_i32_0 = arith.constant 0 : i32
    %c0_i32_1 = arith.constant 0 : i32
    return %c0_i32, %c0_i32_0 : i32, i32
  }
  func.func @transform_3(%arg0: i32) -> (i32, i32) {
    %c0_i32 = arith.constant 0 : i32
    %c0_i32_0 = arith.constant 0 : i32
    %c0_i32_1 = arith.constant 0 : i32
    return %c0_i32, %c0_i32_0 : i32, i32
  }
  func.func @transform_4(%arg0: i32) -> (i32, i32) {
    %c0_i32 = arith.constant 0 : i32
    %c0_i32_0 = arith.constant 0 : i32
    %c0_i32_1 = arith.constant 0 : i32
    return %c0_i32, %c0_i32_0 : i32, i32
  }
  func.func @transform_5(%arg0: i32) -> (i32, i32) {
    %c0_i32 = arith.constant 0 : i32
    %c0_i32_0 = arith.constant 0 : i32
    %c0_i32_1 = arith.constant 0 : i32
    return %c0_i32, %c0_i32_0 : i32, i32
  }
  func.func @transform_6(%arg0: i32) -> (i32, i32) {
    %c0_i32 = arith.constant 0 : i32
    %c0_i32_0 = arith.constant 0 : i32
    %c0_i32_1 = arith.constant 0 : i32
    return %c0_i32, %c0_i32_0 : i32, i32
  }
  func.func @transform_7(%arg0: i32) -> (i32, i32) {
    %c0_i32 = arith.constant 0 : i32
    %c0_i32_0 = arith.constant 0 : i32
    return %arg0, %c0_i32 : i32, i32
  }
}

</mosaic_0001>

<bundles_post_ra>
// kernel: tpu_custom_call.1
= control target key start
LH: loop header
LB: loop body
LE: loop exit
PB: predicated region body
PF: predicated region fallthrough
CT: control target
= control target key end

     0   :  { %vm35_vm0 = vcmask 261120   ;;  %vm113_vm1 = vcmask 523264   ;;  %vm137_vm2 = vcmask 15360   ;;  %s287_s1 = inlined_call_operand.vmem [shape: f32[32,128], index: 1, kind: input, shape index: {}]   ;;  %s288_s3 = inlined_call_operand.vmem [shape: f32[128,64], index: 3, kind: input, shape index: {}]   ;;  %s289_s0 = inlined_call_operand.vmem [shape: f32[8,32], index: 0, kind: input, shape index: {}]   ;;  %s290_s2 = inlined_call_operand.vmem [shape: f32[1,128], index: 2, kind: input, shape index: {}]   ;;  %s291_s4 = inlined_call_operand.vmem [shape: f32[1,64], index: 4, kind: input, shape index: {}]   ;;  %s292_s5 = inlined_call_operand.vmem [shape: f32[64,2], index: 5, kind: input, shape index: {}]   ;;  %s293_s6 = inlined_call_operand.vmem [shape: f32[1,2], index: 6, kind: input, shape index: {}]   ;;  %s294_s7 = inlined_call_operand.vmem [shape: f32[8,2], index: 7, kind: output, shape index: {}]  }
   0x1   :  { %v30_v0 = vld [vmem:[%s287_s1 + $0x18] sm:$0xff]  ;;  %v29_v1 = vld [vmem:[%s287_s1 + $0x10] sm:$0xff]  ;;  %v28_v3 = vld [vmem:[%s287_s1 + $0x8] sm:$0xff] }
   0x2   :  { %51 = vmatpush.msra.mxu0 %v30_v0  ;;  %v75_v2 = vld [vmem:[%s288_s3 + $0x78] sm:$0xff]  ;;  %v74_v4 = vld [vmem:[%s288_s3 + $0x70] sm:$0xff]  ;;  %v73_v5 = vld [vmem:[%s288_s3 + $0x68] sm:$0xff] }
   0x3   :  { %80 = vmatpush.msra.mxu1 %v75_v2  ;;  %v27_v6 = vld [vmem:[%s287_s1] sm:$0xff]  ;;  %v71_v9 = vld [vmem:[%s288_s3 + $0x58] sm:$0xff]  ;;  %v70_v10 = vld [vmem:[%s288_s3 + $0x50] sm:$0xff] }
   0x4   :  { %52 = vmatpush.msra.mxu0 %v29_v1  ;;  %v26_v7 = vld [vmem:[%s289_s0] sm:$0xff]  ;;  %v69_v11 = vld [vmem:[%s288_s3 + $0x48] sm:$0xff]  ;;  %v67_v13 = vld [vmem:[%s288_s3 + $0x38] sm:$0xff] }
   0x5   :  { %81 = vmatpush.msra.mxu1 %v74_v4  ;;  %v72_v8 = vld [vmem:[%s288_s3 + $0x60] sm:$0xff]  ;;  %v66_v14 = vld [vmem:[%s288_s3 + $0x30] sm:$0xff]  ;;  %v65_v15 = vld [vmem:[%s288_s3 + $0x28] sm:$0xff] }
   0x6   :  { %53 = vmatpush.msra.mxu0 %v28_v3  ;;  %v68_v12 = vld [vmem:[%s288_s3 + $0x40] sm:$0xff]  ;;  %v63_v17 = vld [vmem:[%s288_s3 + $0x18] sm:$0xff]  ;;  %v62_v18 = vld [vmem:[%s288_s3 + $0x10] sm:$0xff] }
   0x7   :  { %82 = vmatpush.msra.mxu1 %v73_v5  ;;  %v64_v16 = vld [vmem:[%s288_s3 + $0x20] sm:$0xff]  ;;  %v61_v19 = vld [vmem:[%s288_s3 + $0x8] sm:$0xff]  ;;  %v108_v21 = vld [vmem:[%s292_s5 + $0x38] sm:$0xff] }
   0x8   :  { %54 = vmatpush.msra.mxu0 %v27_v6  ;;  %v60_v20 = vld [vmem:[%s288_s3] sm:$0xff]  ;;  %v107_v22 = vld [vmem:[%s292_s5 + $0x30] sm:$0xff]  ;;  %125 = vmatpush.msra.mxu2 %v108_v21  ;;  %v106_v23 = vld [vmem:[%s292_s5 + $0x28] sm:$0xff] }
   0x9   :  { %143 = vmatmul.msk.f32.vlgmr.msra.gmra.mxu0 %vm35_vm0, %v26_v7  ;;  %83 = vmatpush.msra.mxu1 %v72_v8  ;;  %v105_v24 = vld [vmem:[%s292_s5 + $0x20] sm:$0xff]  ;;  %v104_v25 = vld [vmem:[%s292_s5 + $0x18] sm:$0xff]  ;;  %v103_v30 = vld [vmem:[%s292_s5 + $0x10] sm:$0xff] }
   0xa   :  { %126 = vmatpush.msra.mxu2 %v107_v22  ;;  %v145_v26 = vld [vmem:[%s290_s2] ss:$0 sm:$0xff]  ;;  %v102_v31 = vld [vmem:[%s292_s5 + $0x8] sm:$0xff] }
   0xb   :  { %84 = vmatpush.msra.mxu1 %v71_v9  ;;  %v101_v32 = vld [vmem:[%s292_s5] sm:$0xff] }
   0xc   :  { %127 = vmatpush.msra.mxu2 %v106_v23  ;;  %v146_v33 = vld [vmem:[%s291_s4] ss:$0 sm:$0xff] }
   0xd   :  { %85 = vmatpush.msra.mxu1 %v70_v10  ;;  %v147_v37 = vld [vmem:[%s293_s6] ss:$0 sm:$0xff] }
   0xe   :  { %128 = vmatpush.msra.mxu2 %v105_v24 }
   0xf   :  { %86 = vmatpush.msra.mxu1 %v69_v11 }
  0x10   :  { %129 = vmatpush.msra.mxu2 %v104_v25 }
  0x11   :  { %87 = vmatpush.msra.mxu1 %v68_v12 }
  0x12   :  { %130 = vmatpush.msra.mxu2 %v103_v30 }
  0x13   :  { %88 = vmatpush.msra.mxu1 %v67_v13 }
  0x14   :  { %131 = vmatpush.msra.mxu2 %v102_v31 }
  0x15   :  { %89 = vmatpush.msra.mxu1 %v66_v14 }
  0x16   :  { %132 = vmatpush.msra.mxu2 %v101_v32 }
  0x17   :  { %90 = vmatpush.msra.mxu1 %v65_v15 }
  0x19   :  { %91 = vmatpush.msra.mxu1 %v64_v16 }
  0x1b   :  { %92 = vmatpush.msra.mxu1 %v63_v17 }
  0x1d   :  { %93 = vmatpush.msra.mxu1 %v62_v18 }
  0x1f   :  { %94 = vmatpush.msra.mxu1 %v61_v19 }
  0x21   :  { %95 = vmatpush.msra.mxu1 %v60_v20 }
  0x86   :  { %v56_v27 = vpop.f32.mrf.mxu0 }
  0x87   :  { %v57_v28 = vadd.f32 %v145_v26, %v56_v27 }
  0x89   :  { %v59_v29 = vmax.f32 %v57_v28, 0.0 }
  0x8b   :  { %96 = vmatmul.f32.vlgmr.msra.gmra.mxu1 %v59_v29 }
 0x108   :  { %v97_v34 = vpop.f32.mrf.mxu1 }
 0x109   :  { %v98_v35 = vadd.f32 %v146_v33, %v97_v34 }
 0x10b   :  { %v100_v36 = vmax.f32 %v98_v35, 0.0 }
 0x10d   :  { %144 = vmatmul.msk.f32.vlgmr.msra.gmra.mxu2 %vm113_vm1, %v100_v36 }
 0x190   :  { %v134_v38 = vpop.f32.mrf.mxu2 }
 0x191   :  { %v135_v39 = vadd.f32 %v147_v37, %v134_v38 }
 0x193   :  { %138 = vst.msk [vmem:[%s294_s7] sm:$0xff] %vm137_vm2, %v135_v39 }

</bundles_post_ra>
